<compile_context>
chip_gen: v7x
topology: tpu7x:2x2x1
jax: 0.10.0
libtpu: 0.0.40
codegen_flags: <defaults>
</compile_context>

<pallas_src>
import jax
import jax.numpy as jnp
from jax.experimental import pallas as pl
from jax.experimental.pallas import tpu as pltpu


def _round_up(x, m):
    return (x + m - 1) // m * m


def _cdiv(a, b):
    return (a + b - 1) // b


def mlp_softmax_kernel(x_ref, w1_ref, b1_ref, w2_ref, b2_ref, w3_ref, b3_ref,
                       o_ref):
    # All compute in float32 (matches x.float() in the torch forward).
    x = x_ref[...].astype(jnp.float32)

    # Layer 1: Linear + ReLU
    h1 = jnp.dot(x, w1_ref[...], preferred_element_type=jnp.float32)
    h1 = jnp.maximum(h1 + b1_ref[...], 0.0)

    # Layer 2: Linear + ReLU
    h2 = jnp.dot(h1, w2_ref[...], preferred_element_type=jnp.float32)
    h2 = jnp.maximum(h2 + b2_ref[...], 0.0)

    # Layer 3: Linear (narrow n_out columns; no lane padding needed)
    logits = jnp.dot(h2, w3_ref[...], preferred_element_type=jnp.float32)
    logits = logits + b3_ref[...]

    # Numerically stable softmax over the real n_out lanes.  Exact division:
    # approx reciprocal previously broke the rows-sum-to-1 check.
    m = jnp.max(logits, axis=-1, keepdims=True)
    e = jnp.exp(logits - m)
    denom = jnp.sum(e, axis=-1, keepdims=True)
    o_ref[...] = (e / denom).astype(o_ref.dtype)


def nn_forward(x, params, *, block_rows=1024):
    """Full NN forward pass in a single batch-tiled Pallas kernel.

    x: (B, n_input) array (any float dtype; cast to f32 inside the kernel).
    params: dict with w1 (n_in,32), b1 (1,32), w2 (32,32), b2 (1,32),
            w3 (32,n_out), b3 (1,n_out)  -- weights stored (in, out),
            i.e. transposed vs torch, so y = x @ W + b == torch's x @ W.T + b.
    """
    B, n_in = x.shape
    n_out = params["w3"].shape[1]

    # --- batch tiling: minimal padding, TB rows per grid step -------------
    B8 = _round_up(max(B, 1), 8)            # sublane granularity
    n_blocks = max(1, _cdiv(B8, block_rows))
    if B8 >= 16:
        n_blocks = max(n_blocks, 2)         # v7x: give both TensorCores work
    TB = _round_up(_cdiv(B8, n_blocks), 8)
    B_pad = TB * n_blocks                   # padding < TB (usually < 8 rows)

    if B_pad != B:
        x_pad = jnp.zeros((B_pad, n_in), x.dtype).at[:B].set(x)
    else:
        x_pad = x

    def const_spec(shape):
        # Full-array block, same block every grid step -> stays VMEM-resident.
        zeros = (0,) * len(shape)
        return pl.BlockSpec(shape, lambda i: zeros)

    flops = 2 * B_pad * (n_in * 32 + 32 * 32 + 32 * n_out)
    bytes_accessed = (
        x_pad.size * x_pad.dtype.itemsize
        + 4 * sum(params[k].size for k in ("w1", "b1", "w2", "b2", "w3", "b3"))
        + 4 * B_pad * n_out)

    out = pl.pallas_call(
        mlp_softmax_kernel,
        out_shape=jax.ShapeDtypeStruct((B_pad, n_out), jnp.float32),
        grid=(n_blocks,),
        in_specs=[
            pl.BlockSpec((TB, n_in), lambda i: (i, 0)),
            const_spec(params["w1"].shape),
            const_spec(params["b1"].shape),
            const_spec(params["w2"].shape),
            const_spec(params["b2"].shape),
            const_spec(params["w3"].shape),
            const_spec(params["b3"].shape),
        ],
        out_specs=pl.BlockSpec((TB, n_out), lambda i: (i, 0)),
        compiler_params=pltpu.CompilerParams(
            dimension_semantics=("parallel",)),
        cost_estimate=pl.CostEstimate(
            flops=flops,
            transcendentals=B_pad * n_out,
            bytes_accessed=bytes_accessed),
    )(x_pad, params["w1"], params["b1"], params["w2"], params["b2"],
      params["w3"], params["b3"])

    # Row slice only when rows were actually padded; no lane slice anymore.
    return out if B_pad == B else out[:B]


def init_params(key, n_input, n_output):
    """Deterministic parameter init mirroring nn.Linear shapes.

    torch.nn.Linear(in, out) has weight (out, in) and bias (out,); we keep the
    transposed (in, out) layout and (1, out) biases for the kernel.
    """
    ks = jax.random.split(key, 6)

    def lin(kw, kb, fan_in, fan_out):
        bound = 1.0 / jnp.sqrt(jnp.float32(fan_in))
        w = jax.random.uniform(kw, (fan_in, fan_out), jnp.float32, -bound, bound)
        b = jax.random.uniform(kb, (1, fan_out), jnp.float32, -bound, bound)
        return w, b

    w1, b1 = lin(ks[0], ks[1], n_input, 32)
    w2, b2 = lin(ks[2], ks[3], 32, 32)
    w3, b3 = lin(ks[4], ks[5], 32, n_output)
    return {"w1": w1, "b1": b1, "w2": w2, "b2": b2, "w3": w3, "b3": b3}


def _ref_forward(x, p):
    h = jnp.maximum(x.astype(jnp.float32) @ p["w1"] + p["b1"], 0.0)
    h = jnp.maximum(h @ p["w2"] + p["b2"], 0.0)
    logits = h @ p["w3"] + p["b3"]
    return jax.nn.softmax(logits, axis=-1)


if __name__ == "__main__":
    key = jax.random.PRNGKey(0)
    k_x, k_p, k_x2 = jax.random.split(key, 3)

    n_input, n_output, batch = 16, 8, 8
    x = jax.random.normal(k_x, (batch, n_input), jnp.float32)
    params = init_params(k_p, n_input, n_output)

    out = jax.block_until_ready(nn_forward(x, params))

    # Sanity: shape, softmax rows sum to 1, and match plain-JAX reference.
    assert out.shape == (batch, n_output)
    assert bool(jnp.allclose(jnp.sum(out, axis=-1), 1.0, atol=2e-3))
    assert bool(jnp.allclose(out, _ref_forward(x, params), atol=2e-3))

    # Exercise the non-multiple-of-8 / padded-row path as well.
    x2 = jax.random.normal(k_x2, (5, n_input), jnp.float32)
    out2 = jax.block_until_ready(nn_forward(x2, params))
    assert out2.shape == (5, n_output)
    assert bool(jnp.allclose(jnp.sum(out2, axis=-1), 1.0, atol=2e-3))
    assert bool(jnp.allclose(out2, _ref_forward(x2, params), atol=2e-3))

    print("KERNEL_OK")
</pallas_src>

<mosaic_0001>
module attributes {stable_mosaic.version = 11 : i64} {
  func.func @mlp_softmax_kernel(%arg0: i32, %arg1: memref<8x16xf32, #tpu.memory_space<vmem>>, %arg2: memref<16x32xf32, #tpu.memory_space<vmem>>, %arg3: memref<1x32xf32, #tpu.memory_space<vmem>>, %arg4: memref<32x32xf32, #tpu.memory_space<vmem>>, %arg5: memref<1x32xf32, #tpu.memory_space<vmem>>, %arg6: memref<32x8xf32, #tpu.memory_space<vmem>>, %arg7: memref<1x8xf32, #tpu.memory_space<vmem>>, %arg8: memref<8x8xf32, #tpu.memory_space<vmem>>) attributes {dimension_semantics = [#tpu.dimension_semantics<parallel>], iteration_bounds = array<i64: 1>, scalar_prefetch = 0 : i64, scratch_operands = 0 : i64, tpu.core_type = #tpu.core_type<tc>, window_params = [{transform_indices = @transform_0, window_bounds = array<i64: 8, 16>}, {pipeline_mode = #tpu.pipeline_mode<synchronous>, transform_indices = @transform_1, window_bounds = array<i64: 16, 32>}, {pipeline_mode = #tpu.pipeline_mode<synchronous>, transform_indices = @transform_2, window_bounds = array<i64: 1, 32>}, {pipeline_mode = #tpu.pipeline_mode<synchronous>, transform_indices = @transform_3, window_bounds = array<i64: 32, 32>}, {pipeline_mode = #tpu.pipeline_mode<synchronous>, transform_indices = @transform_4, window_bounds = array<i64: 1, 32>}, {pipeline_mode = #tpu.pipeline_mode<synchronous>, transform_indices = @transform_5, window_bounds = array<i64: 32, 8>}, {pipeline_mode = #tpu.pipeline_mode<synchronous>, transform_indices = @transform_6, window_bounds = array<i64: 1, 8>}, {transform_indices = @transform_7, window_bounds = array<i64: 8, 8>}]} {
    %c0 = arith.constant 0 : index
    %c0_0 = arith.constant 0 : index
    %0 = vector.load %arg1[%c0, %c0_0] : memref<8x16xf32, #tpu.memory_space<vmem>>, vector<8x16xf32>
    %c0_1 = arith.constant 0 : index
    %c0_2 = arith.constant 0 : index
    %1 = vector.load %arg2[%c0_1, %c0_2] : memref<16x32xf32, #tpu.memory_space<vmem>>, vector<16x32xf32>
    %cst = arith.constant dense<0.000000e+00> : vector<8x32xf32>
    %2 = tpu.matmul %0, %1, %cst {dimension_numbers = #tpu.dot_dimension_numbers<[1], [0], [0], [1], [0, 0, 1, 1], [], []>} : vector<8x16xf32>, vector<16x32xf32>, vector<8x32xf32> -> vector<8x32xf32>
    %c0_3 = arith.constant 0 : index
    %c0_4 = arith.constant 0 : index
    %3 = vector.load %arg3[%c0_3, %c0_4] : memref<1x32xf32, #tpu.memory_space<vmem>>, vector<1x32xf32>
    %4 = vector.broadcast %3 : vector<1x32xf32> to vector<8x32xf32>
    %5 = arith.addf %2, %4 : vector<8x32xf32>
    %cst_5 = arith.constant 0.000000e+00 : f32
    %6 = vector.broadcast %cst_5 : f32 to vector<8x32xf32>
    %7 = arith.maximumf %5, %6 : vector<8x32xf32>
    %c0_6 = arith.constant 0 : index
    %c0_7 = arith.constant 0 : index
    %8 = vector.load %arg4[%c0_6, %c0_7] : memref<32x32xf32, #tpu.memory_space<vmem>>, vector<32x32xf32>
    %cst_8 = arith.constant dense<0.000000e+00> : vector<8x32xf32>
    %9 = tpu.matmul %7, %8, %cst_8 {dimension_numbers = #tpu.dot_dimension_numbers<[1], [0], [0], [1], [0, 0, 1, 1], [], []>} : vector<8x32xf32>, vector<32x32xf32>, vector<8x32xf32> -> vector<8x32xf32>
    %c0_9 = arith.constant 0 : index
    %c0_10 = arith.constant 0 : index
    %10 = vector.load %arg5[%c0_9, %c0_10] : memref<1x32xf32, #tpu.memory_space<vmem>>, vector<1x32xf32>
    %11 = vector.broadcast %10 : vector<1x32xf32> to vector<8x32xf32>
    %12 = arith.addf %9, %11 : vector<8x32xf32>
    %cst_11 = arith.constant 0.000000e+00 : f32
    %13 = vector.broadcast %cst_11 : f32 to vector<8x32xf32>
    %14 = arith.maximumf %12, %13 : vector<8x32xf32>
    %c0_12 = arith.constant 0 : index
    %c0_13 = arith.constant 0 : index
    %15 = vector.load %arg6[%c0_12, %c0_13] : memref<32x8xf32, #tpu.memory_space<vmem>>, vector<32x8xf32>
    %cst_14 = arith.constant dense<0.000000e+00> : vector<8x8xf32>
    %16 = tpu.matmul %14, %15, %cst_14 {dimension_numbers = #tpu.dot_dimension_numbers<[1], [0], [0], [1], [0, 0, 1, 1], [], []>} : vector<8x32xf32>, vector<32x8xf32>, vector<8x8xf32> -> vector<8x8xf32>
    %c0_15 = arith.constant 0 : index
    %c0_16 = arith.constant 0 : index
    %17 = vector.load %arg7[%c0_15, %c0_16] : memref<1x8xf32, #tpu.memory_space<vmem>>, vector<1x8xf32>
    %18 = vector.broadcast %17 : vector<1x8xf32> to vector<8x8xf32>
    %19 = arith.addf %16, %18 : vector<8x8xf32>
    %cst_17 = arith.constant dense<0xFF800000> : vector<8xf32>
    %20 = vector.multi_reduction <maximumf>, %19, %cst_17 [1] : vector<8x8xf32> to vector<8xf32>
    %21 = vector.shape_cast %20 : vector<8xf32> to vector<8x1xf32>
    %22 = vector.broadcast %21 : vector<8x1xf32> to vector<8x8xf32>
    %23 = arith.subf %19, %22 : vector<8x8xf32>
    %24 = math.exp %23 : vector<8x8xf32>
    %cst_18 = arith.constant dense<0.000000e+00> : vector<8xf32>
    %25 = vector.multi_reduction <add>, %24, %cst_18 [1] : vector<8x8xf32> to vector<8xf32>
    %26 = vector.shape_cast %25 : vector<8xf32> to vector<8x1xf32>
    %27 = vector.broadcast %26 : vector<8x1xf32> to vector<8x8xf32>
    %28 = arith.divf %24, %27 : vector<8x8xf32>
    %c0_19 = arith.constant 0 : index
    %c0_20 = arith.constant 0 : index
    %29 = vector.load %arg8[%c0_19, %c0_20] : memref<8x8xf32, #tpu.memory_space<vmem>>, vector<8x8xf32>
    tpu.vector_store %arg8[%c0_19, %c0_20], %28 {strides = array<i32>} : memref<8x8xf32, #tpu.memory_space<vmem>>, vector<8x8xf32>,
    return
  }
  func.func @transform_0(%arg0: i32) -> (i32, i32) {
    %c0_i32 = arith.constant 0 : i32
    %c0_i32_0 = arith.constant 0 : i32
    return %arg0, %c0_i32 : i32, i32
  }
  func.func @transform_1(%arg0: i32) -> (i32, i32) {
    %c0_i32 = arith.constant 0 : i32
    %c0_i32_0 = arith.constant 0 : i32
    %c0_i32_1 = arith.constant 0 : i32
    return %c0_i32, %c0_i32_0 : i32, i32
  }
  func.func @transform_2(%arg0: i32) -> (i32, i32) {
    %c0_i32 = arith.constant 0 : i32
    %c0_i32_0 = arith.constant 0 : i32
    %c0_i32_1 = arith.constant 0 : i32
    return %c0_i32, %c0_i32_0 : i32, i32
  }
  func.func @transform_3(%arg0: i32) -> (i32, i32) {
    %c0_i32 = arith.constant 0 : i32
    %c0_i32_0 = arith.constant 0 : i32
    %c0_i32_1 = arith.constant 0 : i32
    return %c0_i32, %c0_i32_0 : i32, i32
  }
  func.func @transform_4(%arg0: i32) -> (i32, i32) {
    %c0_i32 = arith.constant 0 : i32
    %c0_i32_0 = arith.constant 0 : i32
    %c0_i32_1 = arith.constant 0 : i32
    return %c0_i32, %c0_i32_0 : i32, i32
  }
  func.func @transform_5(%arg0: i32) -> (i32, i32) {
    %c0_i32 = arith.constant 0 : i32
    %c0_i32_0 = arith.constant 0 : i32
    %c0_i32_1 = arith.constant 0 : i32
    return %c0_i32, %c0_i32_0 : i32, i32
  }
  func.func @transform_6(%arg0: i32) -> (i32, i32) {
    %c0_i32 = arith.constant 0 : i32
    %c0_i32_0 = arith.constant 0 : i32
    %c0_i32_1 = arith.constant 0 : i32
    return %c0_i32, %c0_i32_0 : i32, i32
  }
  func.func @transform_7(%arg0: i32) -> (i32, i32) {
    %c0_i32 = arith.constant 0 : i32
    %c0_i32_0 = arith.constant 0 : i32
    return %arg0, %c0_i32 : i32, i32
  }
}

</mosaic_0001>

<bundles_post_ra>
// kernel: tpu_custom_call.1
= control target key start
LH: loop header
LB: loop body
LE: loop exit
PB: predicated region body
PF: predicated region fallthrough
CT: control target
= control target key end

     0   :  { %12 = vsyncpa [#allocation3], 0  ;;  %s556_s0 = inlined_call_operand.hbm [shape: f32[8,16], index: 0, kind: input, shape index: {}]   ;;  %s557_s1 = inlined_call_operand.vmem [shape: f32[16,32], index: 1, kind: input, shape index: {}]   ;;  %s558_s2 = inlined_call_operand.vmem [shape: f32[1,32], index: 2, kind: input, shape index: {}]   ;;  %s559_s3 = inlined_call_operand.vmem [shape: f32[32,32], index: 3, kind: input, shape index: {}]   ;;  %s560_s4 = inlined_call_operand.vmem [shape: f32[1,32], index: 4, kind: input, shape index: {}]   ;;  %s561_s5 = inlined_call_operand.vmem [shape: f32[32,8], index: 5, kind: input, shape index: {}]   ;;  %s562_s6 = inlined_call_operand.vmem [shape: f32[1,8], index: 6, kind: input, shape index: {}]   ;;  %s563_s7 = inlined_call_operand.hbm [shape: f32[8,8], index: 7, kind: output, shape index: {}]  }
   0x1   :  { %13 = vsyncpa [#allocation4], 0  ;;  %s442_s24 = smov [#allocation2]   ;;  %s394_s28 = scalar_lea.hbm %s556_s0, 128 }
   0x2   :  { %s20_s25 = sshll.u32 %s442_s24, 4  ;;  %p395_p0 = scmp.ne.s32.totalorder %s556_s0, %s394_s28  ;;  %s21_s25 = int_to_ptr.vmem [resolvable:$true] %s20_s25 }
   0x3   :  { %p398_p1 = scmp.lt.u32.totalorder %s394_s28, %s556_s0 }
   0x5   :  { %p400_p2 = pnand %p398_p1, %p395_p0 }
   0x7   :  { %403 = shalt.err (!%p400_p2)
}
   0x8   :  { %s404_s10 = scalar_lea.vmem %s21_s25, 128  ;;  %p409_p4 = scmp.lt.s32.totalorder %s21_s25, %s21_s25 }
   0x9   :  { %p405_p3 = scmp.ne.s32.totalorder %s21_s25, %s404_s10  ;;  %p410_p5 = scmp.lt.s32.totalorder %s404_s10, %s404_s10 }
   0xb   :  { %p411_p6 = por %p410_p5, %p409_p4 }
   0xd   :  { %p412_p7 = pnand %p411_p6, %p405_p3 }
   0xf   :  { %415 = shalt.err (!%p412_p7)
}
  0x10   :  { %23 = dma.hbm_to_vmem [thread:$0]  %s556_s0, 128, %s21_s25, [#allocation3]  }
  0x11   :  { %438 = dma.done.wait [#allocation3], 128  }
  0x12   :  { %439 = vsyncadd [#allocation3], 4294967168  ;;  %v443_v0 = vmov 0.0|0.0   ;;  %vm444_vm0 = vmmov 0   ;;  %v445_v1 = vmov 0.0   ;;  %v40_v2 = vld [vmem:[%s557_s1] sm:$0xff] }
  0x13   :  { %370 = vmatprep.subr.bf16.mxu0 %v443_v0  ;;  %345 = vmatprep.mubr.msk.f32.mxu0 %vm444_vm0, %v445_v1  ;;  %v41_v3 = vld [vmem:[%s557_s1 + $0x8] sm:$0xff]  ;;  %v124_v5 = vld [vmem:[%s559_s3] sm:$0xff]  ;;  %vm49_vm1 = vcmask 130048   ;;  %v126_v9 = vld [vmem:[%s559_s3 + $0x10] sm:$0xff]  ;;  %vm135_vm2 = vcmask 261120   ;;  %vm294_vm3 = vcmask 64512  }
  0x14   :  { %373 = vmatprep.subr.bf16.mxu1 %v443_v0  ;;  %356 = vmatprep.mubr.msk.f32.mxu1 %vm444_vm0, %v445_v1  ;;  %v371_v4 = vpack.c.bf16 %v41_v3, %v40_v2  ;;  %v125_v6 = vld [vmem:[%s559_s3 + $0x8] sm:$0xff]  ;;  %v39_v8 = vld [vmem:[#allocation2] sm:$0xff]  ;;  %v127_v10 = vld [vmem:[%s559_s3 + $0x18] sm:$0xff] }
  0x15   :  { %v374_v7 = vpack.c.bf16 %v125_v6, %v124_v5  ;;  %v377_v11 = vpack.c.bf16 %v127_v10, %v126_v9  ;;  %v210_v12 = vld [vmem:[%s561_s5] sm:$0xff]  ;;  %v211_v13 = vld [vmem:[%s561_s5 + $0x8] sm:$0xff]  ;;  %v212_v20 = vld [vmem:[%s561_s5 + $0x10] sm:$0xff] }
  0x16   :  { %372 = vmatpush3.bf16.msra.mxu0 %v371_v4  ;;  %v380_v14 = vpack.c.bf16 %v211_v13, %v210_v12  ;;  %v322_v15 = vld [vmem:[%s558_s2] ss:$0 sm:$0xff]  ;;  %v213_v21 = vld [vmem:[%s561_s5 + $0x18] sm:$0xff] }
  0x17   :  { %375 = vmatpush3.bf16.msra.mxu1 %v374_v7  ;;  %379 = vmatprep.subr.bf16.mxu0 %v443_v0  ;;  %v383_v22 = vpack.c.bf16 %v213_v21, %v212_v20  ;;  %v324_v23 = vld [vmem:[%s560_s4] ss:$0 sm:$0xff]  ;;  %s446_s4 = smov [#allocation5]  }
  0x18   :  { %376 = vmatprep.subr.bf16.mxu1 %v443_v0  ;;  %v326_v28 = vld [vmem:[%s562_s6] ss:$0 sm:$0xff]  ;;  %s313_s5 = sshll.u32 %s446_s4, 4  ;;  %s314_s5 = int_to_ptr.vmem [resolvable:$true] %s313_s5 }
  0x19   :  { %346 = vmatmul.mubr.msk.f32.vlgmr.msra.gmra.mrb[0].mxu0 %vm49_vm1, %v39_v8  ;;  %s416_s6 = scalar_lea.vmem %s314_s5, 128  ;;  %p421_p9 = scmp.lt.s32.totalorder %s314_s5, %s314_s5 }
  0x1a   :  { %367 = vmatprep.mubr.msk.f32.mxu0 %vm444_vm0, %v445_v1  ;;  %381 = vmatpush3.bf16.msra.mxu0 %v380_v14  ;;  %p417_p8 = scmp.ne.s32.totalorder %s314_s5, %s416_s6  ;;  %p422_p10 = scmp.lt.s32.totalorder %s416_s6, %s416_s6 }
  0x1b   :  { %378 = vmatpush3.bf16.msra.mxu1 %v377_v11  ;;  %382 = vmatprep.subr.bf16.mxu0 %v443_v0 }
  0x1c   :  { %p423_p11 = por %p422_p10, %p421_p9 }
  0x1e   :  { %384 = vmatpush3.bf16.msra.mxu0 %v383_v22  ;;  %p424_p12 = pnand %p423_p11, %p417_p8 }
  0xec   :  { %v119_v16 = vpop.f32.mrb[0].mxu0 }
  0xed   :  { %v120_v17 = vadd.f32 %v322_v15, %v119_v16  ;;  %v347_v18 = vpop.f32.mrb[1].mxu0 }
  0xef   :  { %v123_v19 = vmax.f32 %v120_v17, 0.0 }
  0xf1   :  { %357 = vmatmul.mubr.msk.f32.vlgmr.msra.gmra.mrb[0].mxu1 %vm135_vm2, %v123_v19 }
 0x1c4   :  { %v205_v24 = vpop.f32.mrb[0].mxu1 }
 0x1c5   :  { %v206_v25 = vadd.f32 %v324_v23, %v205_v24  ;;  %v358_v26 = vpop.f32.mrb[1].mxu1 }
 0x1c7   :  { %v209_v27 = vmax.f32 %v206_v25, 0.0 }
 0x1c9   :  { %368 = vmatmul.mubr.msk.f32.vlgmr.msra.gmra.mrb[2].mxu0 %vm135_vm2, %v209_v27 }
 0x29c   :  { %v290_v29 = vpop.f32.mrb[2].mxu0 }
 0x29d   :  { %v291_v30 = vadd.f32 %v326_v28, %v290_v29  ;;  %v369_v31 = vpop.f32.mrb[3].mxu0 }
 0x29f   :  { %v295_v32 = vsel %vm294_vm3, %v291_v30, -inf }
 0x2a0   :  { %296 = vmax.xlane.f32.xlu0 %v295_v32 }
 0x32d   :  { %v297_v33 = vpop.xlane.xlu0 %296 }
 0x32e   :  { %v298_v34 = vsub.f32 %v291_v30, %v297_v33 }
 0x330   :  { %v299_v35 = vmul.f32 1.442695, %v298_v34 }
 0x332   :  { %390 = vpow2.f32 %v299_v35 }
 0x33c   :  { %v391_v36 = vpop.eup %390 }
 0x33d   :  { %v301_v37 = vsel %vm294_vm3, %v391_v36, 0.0 }
 0x33e   :  { %302 = vadd.xlane.f32.xlu0 %v301_v37 }
 0x3cb   :  { %v303_v38 = vpop.xlane.xlu0 %302 }
 0x3cc   :  { %392 = vrcp.f32 %v303_v38 }
 0x3d6   :  { %v393_v39 = vpop.eup %392 }
 0x3d7   :  { %v305_v40 = vmul.f32 %v393_v39, %v391_v36 }
 0x3d9   :  { %306 = vst.msk [vmem:[#allocation5] sm:$0xff] %vm294_vm3, %v305_v40 }
 0x3da   :  { %427 = shalt.err (!%p424_p12)
}
 0x3db   :  { %s428_s14 = scalar_lea.hbm %s563_s7, 128 }
 0x3dc   :  { %p429_p13 = scmp.ne.s32.totalorder %s563_s7, %s428_s14  ;;  %p432_p0 = scmp.lt.u32.totalorder %s428_s14, %s563_s7 }
 0x3de   :  { %p434_p1 = pnand %p432_p0, %p429_p13 }
 0x3e0   :  { %437 = shalt.err (!%p434_p1)
}
 0x3e1   :  { %316 = dma.vmem_to_hbm [thread:$0]  %s314_s5, 128, %s563_s7, [#allocation4]  }
 0x3e2   :  { %440 = dma.done.wait [#allocation4], 128  }
 0x3e3   :  { %441 = vsyncadd [#allocation4], 4294967168 }
 0x3e4   :  { %320 = vsyncpa [#allocation3], 1 }
 0x3e5   :  { %321 = vsyncpa [#allocation4], 1 }

</bundles_post_ra>
